<compile_context>
chip_gen: v5e
topology: v5e:2x2
jax: 0.10.0
libtpu: 0.0.40
codegen_flags: <defaults>
</compile_context>

<pallas_src>
import functools

import jax
import jax.numpy as jnp
from jax.experimental import pallas as pl
from jax.experimental.pallas import tpu as pltpu


def _conloss_kernel(ls_ref, img_ref, eeg_ref, out_ref,
                    m_row, l_row, m_col, l_col, acc, *, batch):
    i = pl.program_id(0)            # row block of logits (image rows)
    j = pl.program_id(1)            # col block of logits (eeg rows), innermost
    ni = pl.num_programs(0)
    nj = pl.num_programs(1)

    scale = jnp.exp(ls_ref[0, 0])   # exp(logit_scale), f32 scalar

    img = img_ref[...]              # (bb, D), native dtype (bf16 fine for MXU)
    eeg = eeg_ref[...]              # (bb, D)

    # logits tile = scale * img @ eeg.T, with the transpose absorbed into the
    # contraction dims (both contract on axis 1); f32 accumulation on the MXU.
    z = jax.lax.dot_general(
        img, eeg,
        dimension_numbers=(((1,), (1,)), ((), ())),
        preferred_element_type=jnp.float32)          # (bb, bb)
    z = z * scale                                    # single f32 pass per tile

    # ---------------- init ----------------
    @pl.when(jnp.logical_and(i == 0, j == 0))
    def _init_global():
        acc[...] = jnp.zeros_like(acc)
        m_col[...] = jnp.full_like(m_col, -jnp.inf)
        l_col[...] = jnp.zeros_like(l_col)

    @pl.when(j == 0)
    def _init_row():
        m_row[...] = jnp.full_like(m_row, -jnp.inf)
        l_row[...] = jnp.zeros_like(l_row)

    # ---- online LSE, row direction (softmax over eeg for each image) ----
    t_rmax = jnp.max(z, axis=1, keepdims=True)                 # (bb, 1)
    m_r_new = jnp.maximum(m_row[...], t_rmax)
    l_row[...] = (l_row[...] * jnp.exp(m_row[...] - m_r_new)
                  + jnp.sum(jnp.exp(z - m_r_new), axis=1, keepdims=True))
    m_row[...] = m_r_new

    # ---- online LSE, column direction (softmax over images for each eeg) ----
    t_cmax = jnp.max(z, axis=0, keepdims=True)                 # (1, bb)
    m_c_old = m_col[j]                                         # (1, bb)
    m_c_new = jnp.maximum(m_c_old, t_cmax)
    l_col[j] = (l_col[j] * jnp.exp(m_c_old - m_c_new)
                + jnp.sum(jnp.exp(z - m_c_new), axis=0, keepdims=True))
    m_col[j] = m_c_new

    # ---- diagonal: logits[r, r] = scale * <img[r], eeg[r]> (feature dot) ----
    @pl.when(i == j)
    def _diag():
        d = scale * jnp.sum(img.astype(jnp.float32) * eeg.astype(jnp.float32))
        acc[...] = acc[...] - 2.0 * d      # subtracted once per CE direction

    # ---- finalize row LSE for this row block (last col block of this row) ----
    @pl.when(j == nj - 1)
    def _fin_row():
        acc[...] = acc[...] + jnp.sum(m_row[...] + jnp.log(l_row[...]))

    # ---- finalize column LSE and emit loss at the very last grid point ----
    @pl.when(jnp.logical_and(i == ni - 1, j == nj - 1))
    def _fin_all():
        col_sum = jnp.sum(m_col[...] + jnp.log(l_col[...]))
        total = acc[...] + col_sum                              # (1, 1)
        out_ref[0, 0] = total[0, 0] / jnp.float32(2 * batch)


def _pick_block(batch):
    # Largest 128-aligned tile <= 256 that evenly divides the batch; otherwise
    # fall back to a single full block (always valid per the BlockSpec rules).
    for t in (256, 128):
        if batch % t == 0 and batch > t:
            return t
    return batch


def con_loss(image_features, eeg_features, logit_scale, *, block_b=None):
    """Pallas implementation of ConLoss.forward.

    image_features: (B, D), eeg_features: (B, D), logit_scale: scalar (pre-exp).
    Returns a scalar f32 loss = 0.5 * (CE(logits, arange) + CE(logits.T, arange))
    with logits = exp(logit_scale) * image_features @ eeg_features.T.
    """
    B, D = image_features.shape
    assert eeg_features.shape == (B, D)

    if block_b is None:
        block_b = _pick_block(B)
    if B % block_b != 0:
        block_b = B
    nblk = B // block_b

    ls = jnp.asarray(logit_scale, jnp.float32).reshape(1, 1)

    kernel = functools.partial(_conloss_kernel, batch=B)

    out = pl.pallas_call(
        kernel,
        out_shape=jax.ShapeDtypeStruct((1, 1), jnp.float32),
        grid=(nblk, nblk),
        in_specs=[
            pl.BlockSpec(memory_space=pltpu.SMEM),                 # logit_scale
            pl.BlockSpec((block_b, D), lambda i, j: (i, 0)),       # image rows
            pl.BlockSpec((block_b, D), lambda i, j: (j, 0)),       # eeg rows
        ],
        out_specs=pl.BlockSpec(memory_space=pltpu.SMEM),
        scratch_shapes=[
            pltpu.VMEM((block_b, 1), jnp.float32),        # m_row (running max)
            pltpu.VMEM((block_b, 1), jnp.float32),        # l_row (running sum)
            pltpu.VMEM((nblk, 1, block_b), jnp.float32),  # m_col (all col blocks)
            pltpu.VMEM((nblk, 1, block_b), jnp.float32),  # l_col (all col blocks)
            pltpu.VMEM((1, 1), jnp.float32),              # scalar loss accumulator
        ],
        compiler_params=pltpu.CompilerParams(
            # Both axes touch shared accumulators -> "arbitrary" (sequential).
            dimension_semantics=("arbitrary", "arbitrary"),
            vmem_limit_bytes=32 * 1024 * 1024,
        ),
    )(ls, image_features, eeg_features)
    return out[0, 0]


def _con_loss_ref(image_features, eeg_features, logit_scale):
    # Pure-JAX reference for correctness checking.
    scale = jnp.exp(jnp.float32(logit_scale))
    logits = scale * (image_features.astype(jnp.float32)
                      @ eeg_features.astype(jnp.float32).T)
    B = logits.shape[0]
    labels = jnp.arange(B)

    def ce(lg):
        lse = jax.nn.logsumexp(lg, axis=1)
        return jnp.mean(lse - lg[jnp.arange(B), labels])

    return 0.5 * (ce(logits) + ce(logits.T))


if __name__ == "__main__":
    key = jax.random.PRNGKey(0)
    k1, k2, k3, k4 = jax.random.split(key, 4)

    def make_features(ka, kb, B, D):
        a = jax.random.normal(ka, (B, D), dtype=jnp.float32)
        a = a / jnp.linalg.norm(a, axis=1, keepdims=True)
        b = jax.random.normal(kb, (B, D), dtype=jnp.float32)
        b = b / jnp.linalg.norm(b, axis=1, keepdims=True)
        return a, b

    # CLIP-style learnable logit scale, ln(1/0.07).
    logit_scale = jnp.float32(jnp.log(1.0 / 0.07))

    # Small case (single block): B=8, D=32.
    img, eeg = make_features(k1, k2, 8, 32)
    loss = jax.block_until_ready(con_loss(img, eeg, logit_scale))
    ref = _con_loss_ref(img, eeg, logit_scale)
    assert jnp.allclose(loss, ref, atol=1e-4, rtol=1e-4), (loss, ref)

    # Multi-tile case exercising the flash-style tiled LSE path (grid 2x2).
    img2, eeg2 = make_features(k3, k4, 256, 32)
    loss2 = jax.block_until_ready(con_loss(img2, eeg2, logit_scale, block_b=128))
    ref2 = _con_loss_ref(img2, eeg2, logit_scale)
    assert jnp.allclose(loss2, ref2, atol=1e-4, rtol=1e-4), (loss2, ref2)

    print("KERNEL_OK")
</pallas_src>

<mosaic_0001>
module attributes {stable_mosaic.version = 11 : i64} {
  func.func @_conloss_kernel(%arg0: i32, %arg1: i32, %arg2: memref<1x1xf32, #tpu.memory_space<smem>>, %arg3: memref<8x32xf32, #tpu.memory_space<vmem>>, %arg4: memref<8x32xf32, #tpu.memory_space<vmem>>, %arg5: memref<1x1xf32, #tpu.memory_space<smem>>, %arg6: memref<8x1xf32, #tpu.memory_space<vmem>>, %arg7: memref<8x1xf32, #tpu.memory_space<vmem>>, %arg8: memref<1x1x8xf32, #tpu.memory_space<vmem>>, %arg9: memref<1x1x8xf32, #tpu.memory_space<vmem>>, %arg10: memref<1x1xf32, #tpu.memory_space<vmem>>) attributes {dimension_semantics = [#tpu.dimension_semantics<arbitrary>, #tpu.dimension_semantics<arbitrary>], iteration_bounds = array<i64: 1, 1>, scalar_prefetch = 0 : i64, scratch_operands = 5 : i64, tpu.core_type = #tpu.core_type<tc>, window_params = [{transform_indices = @transform_0, window_bounds = array<i64: 1, 1>}, {transform_indices = @transform_1, window_bounds = array<i64: 8, 32>}, {transform_indices = @transform_2, window_bounds = array<i64: 8, 32>}, {transform_indices = @transform_3, window_bounds = array<i64: 1, 1>}]} {
    %c0 = arith.constant 0 : index
    %c0_0 = arith.constant 0 : index
    %0 = memref.load %arg2[%c0, %c0_0] : memref<1x1xf32, #tpu.memory_space<smem>>
    %1 = math.exp %0 : f32
    %c0_1 = arith.constant 0 : index
    %c0_2 = arith.constant 0 : index
    %2 = vector.load %arg3[%c0_1, %c0_2] : memref<8x32xf32, #tpu.memory_space<vmem>>, vector<8x32xf32>
    %c0_3 = arith.constant 0 : index
    %c0_4 = arith.constant 0 : index
    %3 = vector.load %arg4[%c0_3, %c0_4] : memref<8x32xf32, #tpu.memory_space<vmem>>, vector<8x32xf32>
    %cst = arith.constant dense<0.000000e+00> : vector<8x8xf32>
    %4 = tpu.matmul %2, %3, %cst {dimension_numbers = #tpu.dot_dimension_numbers<[1], [1], [0], [0], [0, 0, 1, 0], [], []>} : vector<8x32xf32>, vector<8x32xf32>, vector<8x8xf32> -> vector<8x8xf32>
    %5 = vector.broadcast %1 : f32 to vector<8x8xf32>
    %6 = arith.mulf %4, %5 : vector<8x8xf32>
    %c0_i32 = arith.constant 0 : i32
    %7 = arith.cmpi eq, %arg0, %c0_i32 : i32
    %c0_i32_5 = arith.constant 0 : i32
    %8 = arith.cmpi eq, %arg1, %c0_i32_5 : i32
    %9 = arith.andi %7, %8 : i1
    %10 = arith.extui %9 : i1 to i32
    %c0_i32_6 = arith.constant 0 : i32
    %11 = arith.cmpi ne, %10, %c0_i32_6 : i32
    scf.if %11 {
      %cst_37 = arith.constant 0.000000e+00 : f32
      %69 = vector.broadcast %cst_37 : f32 to vector<1x1xf32>
      %c0_38 = arith.constant 0 : index
      %c0_39 = arith.constant 0 : index
      %70 = vector.load %arg10[%c0_38, %c0_39] : memref<1x1xf32, #tpu.memory_space<vmem>>, vector<1x1xf32>
      tpu.vector_store %arg10[%c0_38, %c0_39], %69 {strides = array<i32>} : memref<1x1xf32, #tpu.memory_space<vmem>>, vector<1x1xf32>,
      %cst_40 = arith.constant 0xFF800000 : f32
      %71 = vector.broadcast %cst_40 : f32 to vector<1x1x8xf32>
      %c0_41 = arith.constant 0 : index
      %c0_42 = arith.constant 0 : index
      %c0_43 = arith.constant 0 : index
      %72 = vector.load %arg8[%c0_41, %c0_42, %c0_43] : memref<1x1x8xf32, #tpu.memory_space<vmem>>, vector<1x1x8xf32>
      tpu.vector_store %arg8[%c0_41, %c0_42, %c0_43], %71 {strides = array<i32>} : memref<1x1x8xf32, #tpu.memory_space<vmem>>, vector<1x1x8xf32>,
      %cst_44 = arith.constant 0.000000e+00 : f32
      %73 = vector.broadcast %cst_44 : f32 to vector<1x1x8xf32>
      %c0_45 = arith.constant 0 : index
      %c0_46 = arith.constant 0 : index
      %c0_47 = arith.constant 0 : index
      %74 = vector.load %arg9[%c0_45, %c0_46, %c0_47] : memref<1x1x8xf32, #tpu.memory_space<vmem>>, vector<1x1x8xf32>
      tpu.vector_store %arg9[%c0_45, %c0_46, %c0_47], %73 {strides = array<i32>} : memref<1x1x8xf32, #tpu.memory_space<vmem>>, vector<1x1x8xf32>,
    } else {
    }
    %c0_i32_7 = arith.constant 0 : i32
    %12 = arith.cmpi eq, %arg1, %c0_i32_7 : i32
    %13 = arith.extui %12 : i1 to i32
    %c0_i32_8 = arith.constant 0 : i32
    %14 = arith.cmpi ne, %13, %c0_i32_8 : i32
    scf.if %14 {
      %cst_37 = arith.constant 0xFF800000 : f32
      %69 = vector.broadcast %cst_37 : f32 to vector<8x1xf32>
      %c0_38 = arith.constant 0 : index
      %c0_39 = arith.constant 0 : index
      %70 = vector.load %arg6[%c0_38, %c0_39] : memref<8x1xf32, #tpu.memory_space<vmem>>, vector<8x1xf32>
      tpu.vector_store %arg6[%c0_38, %c0_39], %69 {strides = array<i32>} : memref<8x1xf32, #tpu.memory_space<vmem>>, vector<8x1xf32>,
      %cst_40 = arith.constant 0.000000e+00 : f32
      %71 = vector.broadcast %cst_40 : f32 to vector<8x1xf32>
      %c0_41 = arith.constant 0 : index
      %c0_42 = arith.constant 0 : index
      %72 = vector.load %arg7[%c0_41, %c0_42] : memref<8x1xf32, #tpu.memory_space<vmem>>, vector<8x1xf32>
      tpu.vector_store %arg7[%c0_41, %c0_42], %71 {strides = array<i32>} : memref<8x1xf32, #tpu.memory_space<vmem>>, vector<8x1xf32>,
    } else {
    }
    %cst_9 = arith.constant dense<0xFF800000> : vector<8xf32>
    %15 = vector.multi_reduction <maximumf>, %6, %cst_9 [1] : vector<8x8xf32> to vector<8xf32>
    %16 = vector.shape_cast %15 : vector<8xf32> to vector<8x1xf32>
    %c0_10 = arith.constant 0 : index
    %c0_11 = arith.constant 0 : index
    %17 = vector.load %arg6[%c0_10, %c0_11] : memref<8x1xf32, #tpu.memory_space<vmem>>, vector<8x1xf32>
    %18 = arith.maximumf %17, %16 : vector<8x1xf32>
    %c0_12 = arith.constant 0 : index
    %c0_13 = arith.constant 0 : index
    %19 = vector.load %arg7[%c0_12, %c0_13] : memref<8x1xf32, #tpu.memory_space<vmem>>, vector<8x1xf32>
    %c0_14 = arith.constant 0 : index
    %c0_15 = arith.constant 0 : index
    %20 = vector.load %arg6[%c0_14, %c0_15] : memref<8x1xf32, #tpu.memory_space<vmem>>, vector<8x1xf32>
    %21 = arith.subf %20, %18 : vector<8x1xf32>
    %22 = math.exp %21 : vector<8x1xf32>
    %23 = arith.mulf %19, %22 : vector<8x1xf32>
    %24 = vector.broadcast %18 : vector<8x1xf32> to vector<8x8xf32>
    %25 = arith.subf %6, %24 : vector<8x8xf32>
    %26 = math.exp %25 : vector<8x8xf32>
    %cst_16 = arith.constant dense<0.000000e+00> : vector<8xf32>
    %27 = vector.multi_reduction <add>, %26, %cst_16 [1] : vector<8x8xf32> to vector<8xf32>
    %28 = vector.shape_cast %27 : vector<8xf32> to vector<8x1xf32>
    %29 = arith.addf %23, %28 : vector<8x1xf32>
    %c0_17 = arith.constant 0 : index
    %c0_18 = arith.constant 0 : index
    %30 = vector.load %arg7[%c0_17, %c0_18] : memref<8x1xf32, #tpu.memory_space<vmem>>, vector<8x1xf32>
    tpu.vector_store %arg7[%c0_17, %c0_18], %29 {strides = array<i32>} : memref<8x1xf32, #tpu.memory_space<vmem>>, vector<8x1xf32>,
    %c0_19 = arith.constant 0 : index
    %c0_20 = arith.constant 0 : index
    %31 = vector.load %arg6[%c0_19, %c0_20] : memref<8x1xf32, #tpu.memory_space<vmem>>, vector<8x1xf32>
    tpu.vector_store %arg6[%c0_19, %c0_20], %18 {strides = array<i32>} : memref<8x1xf32, #tpu.memory_space<vmem>>, vector<8x1xf32>,
    %cst_21 = arith.constant dense<0xFF800000> : vector<8xf32>
    %32 = vector.multi_reduction <maximumf>, %6, %cst_21 [0] : vector<8x8xf32> to vector<8xf32>
    %33 = vector.shape_cast %32 : vector<8xf32> to vector<1x8xf32>
    %34 = arith.index_cast %arg1 : i32 to index
    %c0_22 = arith.constant 0 : index
    %c0_23 = arith.constant 0 : index
    %35 = vector.load %arg8[%34, %c0_22, %c0_23] : memref<1x1x8xf32, #tpu.memory_space<vmem>>, vector<1x1x8xf32>
    %36 = vector.shape_cast %35 : vector<1x1x8xf32> to vector<1x8xf32>
    %37 = arith.maximumf %36, %33 : vector<1x8xf32>
    %38 = arith.index_cast %arg1 : i32 to index
    %c0_24 = arith.constant 0 : index
    %c0_25 = arith.constant 0 : index
    %39 = vector.load %arg9[%38, %c0_24, %c0_25] : memref<1x1x8xf32, #tpu.memory_space<vmem>>, vector<1x1x8xf32>
    %40 = vector.shape_cast %39 : vector<1x1x8xf32> to vector<1x8xf32>
    %41 = arith.subf %36, %37 : vector<1x8xf32>
    %42 = math.exp %41 : vector<1x8xf32>
    %43 = arith.mulf %40, %42 : vector<1x8xf32>
    %44 = vector.broadcast %37 : vector<1x8xf32> to vector<8x8xf32>
    %45 = arith.subf %6, %44 : vector<8x8xf32>
    %46 = math.exp %45 : vector<8x8xf32>
    %cst_26 = arith.constant dense<0.000000e+00> : vector<8xf32>
    %47 = vector.multi_reduction <add>, %46, %cst_26 [0] : vector<8x8xf32> to vector<8xf32>
    %48 = vector.shape_cast %47 : vector<8xf32> to vector<1x8xf32>
    %49 = arith.addf %43, %48 : vector<1x8xf32>
    %50 = arith.index_cast %arg1 : i32 to index
    %c0_27 = arith.constant 0 : index
    %c0_28 = arith.constant 0 : index
    %51 = vector.load %arg9[%50, %c0_27, %c0_28] : memref<1x1x8xf32, #tpu.memory_space<vmem>>, vector<1x1x8xf32>
    %52 = vector.shape_cast %51 : vector<1x1x8xf32> to vector<1x8xf32>
    %53 = vector.shape_cast %49 : vector<1x8xf32> to vector<1x1x8xf32>
    tpu.vector_store %arg9[%50, %c0_27, %c0_28], %53 {strides = array<i32>} : memref<1x1x8xf32, #tpu.memory_space<vmem>>, vector<1x1x8xf32>,
    %54 = arith.index_cast %arg1 : i32 to index
    %c0_29 = arith.constant 0 : index
    %c0_30 = arith.constant 0 : index
    %55 = vector.load %arg8[%54, %c0_29, %c0_30] : memref<1x1x8xf32, #tpu.memory_space<vmem>>, vector<1x1x8xf32>
    %56 = vector.shape_cast %55 : vector<1x1x8xf32> to vector<1x8xf32>
    %57 = vector.shape_cast %37 : vector<1x8xf32> to vector<1x1x8xf32>
    tpu.vector_store %arg8[%54, %c0_29, %c0_30], %57 {strides = array<i32>} : memref<1x1x8xf32, #tpu.memory_space<vmem>>, vector<1x1x8xf32>,
    %58 = arith.cmpi eq, %arg0, %arg1 : i32
    %59 = arith.extui %58 : i1 to i32
    %c0_i32_31 = arith.constant 0 : i32
    %60 = arith.cmpi ne, %59, %c0_i32_31 : i32
    scf.if %60 {
      %69 = arith.mulf %2, %3 : vector<8x32xf32>
      %70 = vector.shape_cast %69 : vector<8x32xf32> to vector<1x8x32xf32>
      %cst_37 = arith.constant dense<0.000000e+00> : vector<1xf32>
      %71 = vector.multi_reduction <add>, %70, %cst_37 [1, 2] : vector<1x8x32xf32> to vector<1xf32>
      %72 = vector.shape_cast %71 : vector<1xf32> to vector<1x1x1xf32>
      %73 = vector.extract %72[0, 0, 0] : f32 from vector<1x1x1xf32>
      %74 = arith.mulf %1, %73 : f32
      %c0_38 = arith.constant 0 : index
      %c0_39 = arith.constant 0 : index
      %75 = vector.load %arg10[%c0_38, %c0_39] : memref<1x1xf32, #tpu.memory_space<vmem>>, vector<1x1xf32>
      %cst_40 = arith.constant 2.000000e+00 : f32
      %76 = arith.mulf %cst_40, %74 : f32
      %77 = vector.broadcast %76 : f32 to vector<1x1xf32>
      %78 = arith.subf %75, %77 : vector<1x1xf32>
      %c0_41 = arith.constant 0 : index
      %c0_42 = arith.constant 0 : index
      %79 = vector.load %arg10[%c0_41, %c0_42] : memref<1x1xf32, #tpu.memory_space<vmem>>, vector<1x1xf32>
      tpu.vector_store %arg10[%c0_41, %c0_42], %78 {strides = array<i32>} : memref<1x1xf32, #tpu.memory_space<vmem>>, vector<1x1xf32>,
    } else {
    }
    %c0_i32_32 = arith.constant 0 : i32
    %61 = arith.cmpi eq, %arg1, %c0_i32_32 : i32
    %62 = arith.extui %61 : i1 to i32
    %c0_i32_33 = arith.constant 0 : i32
    %63 = arith.cmpi ne, %62, %c0_i32_33 : i32
    scf.if %63 {
      %c0_37 = arith.constant 0 : index
      %c0_38 = arith.constant 0 : index
      %69 = vector.load %arg10[%c0_37, %c0_38] : memref<1x1xf32, #tpu.memory_space<vmem>>, vector<1x1xf32>
      %c0_39 = arith.constant 0 : index
      %c0_40 = arith.constant 0 : index
      %70 = vector.load %arg6[%c0_39, %c0_40] : memref<8x1xf32, #tpu.memory_space<vmem>>, vector<8x1xf32>
      %c0_41 = arith.constant 0 : index
      %c0_42 = arith.constant 0 : index
      %71 = vector.load %arg7[%c0_41, %c0_42] : memref<8x1xf32, #tpu.memory_space<vmem>>, vector<8x1xf32>
      %72 = math.log %71 : vector<8x1xf32>
      %73 = arith.addf %70, %72 : vector<8x1xf32>
      %74 = vector.shape_cast %73 : vector<8x1xf32> to vector<1x8x1xf32>
      %cst_43 = arith.constant dense<0.000000e+00> : vector<1xf32>
      %75 = vector.multi_reduction <add>, %74, %cst_43 [1, 2] : vector<1x8x1xf32> to vector<1xf32>
      %76 = vector.shape_cast %75 : vector<1xf32> to vector<1x1x1xf32>
      %77 = vector.extract %76[0, 0, 0] : f32 from vector<1x1x1xf32>
      %78 = vector.broadcast %77 : f32 to vector<1x1xf32>
      %79 = arith.addf %69, %78 : vector<1x1xf32>
      %c0_44 = arith.constant 0 : index
      %c0_45 = arith.constant 0 : index
      %80 = vector.load %arg10[%c0_44, %c0_45] : memref<1x1xf32, #tpu.memory_space<vmem>>, vector<1x1xf32>
      tpu.vector_store %arg10[%c0_44, %c0_45], %79 {strides = array<i32>} : memref<1x1xf32, #tpu.memory_space<vmem>>, vector<1x1xf32>,
    } else {
    }
    %c0_i32_34 = arith.constant 0 : i32
    %64 = arith.cmpi eq, %arg0, %c0_i32_34 : i32
    %c0_i32_35 = arith.constant 0 : i32
    %65 = arith.cmpi eq, %arg1, %c0_i32_35 : i32
    %66 = arith.andi %64, %65 : i1
    %67 = arith.extui %66 : i1 to i32
    %c0_i32_36 = arith.constant 0 : i32
    %68 = arith.cmpi ne, %67, %c0_i32_36 : i32
    scf.if %68 {
      %c0_37 = arith.constant 0 : index
      %c0_38 = arith.constant 0 : index
      %c0_39 = arith.constant 0 : index
      %69 = vector.load %arg8[%c0_37, %c0_38, %c0_39] : memref<1x1x8xf32, #tpu.memory_space<vmem>>, vector<1x1x8xf32>
      %c0_40 = arith.constant 0 : index
      %c0_41 = arith.constant 0 : index
      %c0_42 = arith.constant 0 : index
      %70 = vector.load %arg9[%c0_40, %c0_41, %c0_42] : memref<1x1x8xf32, #tpu.memory_space<vmem>>, vector<1x1x8xf32>
      %71 = math.log %70 : vector<1x1x8xf32>
      %72 = arith.addf %69, %71 : vector<1x1x8xf32>
      %73 = vector.shape_cast %72 : vector<1x1x8xf32> to vector<1x1x1x8xf32>
      %cst_43 = arith.constant dense<0.000000e+00> : vector<1xf32>
      %74 = vector.multi_reduction <add>, %73, %cst_43 [1, 2, 3] : vector<1x1x1x8xf32> to vector<1xf32>
      %75 = vector.shape_cast %74 : vector<1xf32> to vector<1x1x1x1xf32>
      %76 = vector.extract %75[0, 0, 0, 0] : f32 from vector<1x1x1x1xf32>
      %c0_44 = arith.constant 0 : index
      %c0_45 = arith.constant 0 : index
      %77 = vector.load %arg10[%c0_44, %c0_45] : memref<1x1xf32, #tpu.memory_space<vmem>>, vector<1x1xf32>
      %78 = vector.broadcast %76 : f32 to vector<1x1xf32>
      %79 = arith.addf %77, %78 : vector<1x1xf32>
      %80 = vector.extract %79[0, 0] : f32 from vector<1x1xf32>
      %cst_46 = arith.constant 1.600000e+01 : f32
      %81 = arith.divf %80, %cst_46 : f32
      %c0_47 = arith.constant 0 : index
      %c0_48 = arith.constant 0 : index
      %82 = memref.load %arg5[%c0_47, %c0_48] : memref<1x1xf32, #tpu.memory_space<smem>>
      memref.store %81, %arg5[%c0_47, %c0_48] : memref<1x1xf32, #tpu.memory_space<smem>>
    } else {
    }
    return
  }
  func.func @transform_0(%arg0: i32, %arg1: i32) -> (i32, i32) {
    %c0_i32 = arith.constant 0 : i32
    %c0_i32_0 = arith.constant 0 : i32
    %c0_i32_1 = arith.constant 0 : i32
    return %c0_i32, %c0_i32_0 : i32, i32
  }
  func.func @transform_1(%arg0: i32, %arg1: i32) -> (i32, i32) {
    %c0_i32 = arith.constant 0 : i32
    %c0_i32_0 = arith.constant 0 : i32
    return %arg0, %c0_i32 : i32, i32
  }
  func.func @transform_2(%arg0: i32, %arg1: i32) -> (i32, i32) {
    %c0_i32 = arith.constant 0 : i32
    %c0_i32_0 = arith.constant 0 : i32
    return %arg1, %c0_i32 : i32, i32
  }
  func.func @transform_3(%arg0: i32, %arg1: i32) -> (i32, i32) {
    %c0_i32 = arith.constant 0 : i32
    %c0_i32_0 = arith.constant 0 : i32
    %c0_i32_1 = arith.constant 0 : i32
    return %c0_i32, %c0_i32_0 : i32, i32
  }
}

</mosaic_0001>

<bundles_post_ra>
// kernel: tpu_custom_call.1
= control target key start
LH: loop header
LB: loop body
LE: loop exit
PB: predicated region body
PF: predicated region fallthrough
CT: control target
= control target key end

     0   :  { %9 = vsyncpa [#allocation9], 0  ;;  %s419_s0 = inlined_call_operand.<no memory space> [shape: f32[1,1], index: 0, kind: input, shape index: {}]   ;;  %s420_s1 = inlined_call_operand.hbm [shape: f32[8,32], index: 1, kind: input, shape index: {}]   ;;  %s421_s2 = inlined_call_operand.hbm [shape: f32[8,32], index: 2, kind: input, shape index: {}]   ;;  %s422_s3 = inlined_call_operand.hbm [shape: f32[1,1], index: 3, kind: output, shape index: {}]  }
   0x1   :  { %10 = vsyncpa [#allocation12], 0 }
   0x2   :  { %11 = vsyncpa [#allocation10], 0  ;;  %s19_s14 = sshll.u32 %s420_s1, 4  ;;  %s351_s15 = smov [#allocation8]   ;;  %s20_s14 = int_to_ptr.hbm [resolvable:$true] %s19_s14 }
   0x3   :  { %s21_s16 = sshll.u32 %s351_s15, 4  ;;  %s30_s19 = sshll.u32 %s421_s2, 4  ;;  %s22_s16 = int_to_ptr.vmem [resolvable:$true] %s21_s16  ;;  %s31_s19 = int_to_ptr.hbm [resolvable:$true] %s30_s19 }
   0x4   :  { %24 = dma.hbm_to_vmem [thread:$0]  %s20_s14, 128, %s22_s16, [#allocation9]  }
   0x5   :  { %s352_s20 = smov [#allocation11]  }
   0x6   :  { %s32_s21 = sshll.u32 %s352_s20, 4  ;;  %s33_s21 = int_to_ptr.vmem [resolvable:$true] %s32_s21 }
   0x7   :  { %35 = dma.hbm_to_vmem [thread:$0]  %s31_s19, 128, %s33_s21, [#allocation12]  }
   0x8   :  { %345 = dma.done.wait [#allocation9], 128  }
   0x9   :  { %346 = vsyncadd [#allocation9], 4294967168 }
   0xa   :  { %347 = dma.done.wait [#allocation12], 128  }
   0xb   :  { %348 = vsyncadd [#allocation12], 4294967168  ;;  %v45_v0 = vstv %s419_s0  ;;  %vm51_vm0 = vcmask 261120   ;;  %v49_v2 = vld [vmem:[#allocation8] sm:$0xff]  ;;  %v50_v3 = vld [vmem:[#allocation11] sm:$0xff]  ;;  %vm88_vm1 = vcmask 57344  }
   0xc   :  { %v46_v1 = vmul.f32 1.442695, %v45_v0  ;;  %247 = vmatpush.xpose.msk.msra.mxu0 %vm51_vm0, %v50_v3  ;;  %v388_v4 = vmul.f32 %v50_v3, %v49_v2  ;;  %v353_v6 = vmov -inf   ;;  %v354_v7 = vmov 0.0   ;;  %s235_s29 = sshll.u32 %s422_s3, 4  ;;  %s357_s6 = smov [#allocation13]   ;;  %s236_s29 = int_to_ptr.hbm [resolvable:$true] %s235_s29 }
   0xd   :  { %89 = vst.msk [vmem:[#allocation4] sm:$0x1] %vm88_vm1, %v353_v6  ;;  %vm97_vm2 = vcmask 64512   ;;  %vm94_vm3 = vcmask 7168   ;;  %v355_v37 = vmov 0   ;;  %vm86_vm4 = vcmask 0  }
   0xe   :  { %269 = vpow2.f32 %v46_v1  ;;  %90 = vst.msk [vmem:[#allocation5] sm:$0x1] %vm88_vm1, %v354_v7  ;;  %268 = vset.pattern.permute.xlu0 %v355_v37  ;;  %v158_v47 = vsel %vm51_vm0, %v388_v4, 0.0 }
   0xf   :  { %248 = vmatmul.msk.f32.vlgmr.msra.gmra.mxu0 %vm51_vm0, %v49_v2  ;;  %95 = vst.msk [vmem:[#allocation2] sm:$0xff] %vm94_vm3, %v353_v6 }
  0x10   :  { %96 = vst.msk [vmem:[#allocation3] sm:$0xff] %vm94_vm3, %v354_v7 }
  0x11   :  { %87 = vst.msk [vmem:[#allocation6] sm:$0x1] %vm86_vm4, %v354_v7 }
  0x14   :  { %v270_v5 = vpop.eup %269  ;;  %v129_v17 = vld [vmem:[#allocation4] sm:$0x1] }
  0x15   :  { %249 = vpush %v270_v5  ;;  %v131_v32 = vld [vmem:[#allocation5] sm:$0x1] }
  0x16   :  { %v101_v38 = vld [vmem:[#allocation2] sm:$0xff] }
  0x17   :  { %v103_v50 = vld [vmem:[#allocation3] sm:$0xff] }
  0x46   :  { %s394_s0 = spop %249 }
  0x47   :  { %v78_v8 = vstv %s394_s0 }
  0x8c   :  { %v75_v9 = vpop.f32.mrf.mxu0 }
  0x8d   :  { %v79_v10 = vmul.f32 %v78_v8, %v75_v9  ;;  %v169_v9 = vld [vmem:[#allocation6] sm:$0x1] }
  0x8f   :  { %v98_v11 = vsel %vm97_vm2, %v79_v10, -inf }
  0x90   :  { %99 = vmax.xlane.f32.xlu0 %v98_v11  ;;  %v123_v12 = vrot.slane %v98_v11, 4 }
  0x92   :  { %v124_v13 = vmax.f32 %v98_v11, %v123_v12 }
  0x94   :  { %v125_v14 = vrot.slane %v124_v13, 2 }
  0x96   :  { %v126_v15 = vmax.f32 %v124_v13, %v125_v14 }
  0x98   :  { %v127_v16 = vrot.slane %v126_v15, 1 }
  0x9a   :  { %v128_v18 = vmax.f32 %v126_v15, %v127_v16 }
  0x9c   :  { %v130_v19 = vmax.f32 %v129_v17, %v128_v18 }
  0x9e   :  { %v137_v20 = vperm.slane %v130_v19, 0  ;;  %152 = vst.msk [vmem:[#allocation4] sm:$0x1] %vm88_vm1, %v130_v19  ;;  %v132_v23 = vsub.f32 %v129_v17, %v130_v19 }
  0xa0   :  { %v139_v21 = vsub.f32 %v79_v10, %v137_v20  ;;  %v133_v24 = vmul.f32 1.442695, %v132_v23 }
  0xa2   :  { %v140_v22 = vmul.f32 1.442695, %v139_v21 }
  0xa4   :  { %271 = vpow2.f32 %v140_v22 }
  0xa5   :  { %273 = vpow2.f32 %v133_v24  ;;  %v200_v6 = vld [vmem:[#allocation4] sm:$0x1] }
  0xaa   :  { %v272_v25 = vpop.eup %271 }
  0xab   :  { %v142_v26 = vsel %vm97_vm2, %v272_v25, 0.0  ;;  %v274_v31 = vpop.eup %273 }
  0xac   :  { %v143_v27 = vrot.slane %v142_v26, 4  ;;  %v135_v34 = vmul.f32 %v274_v31, %v131_v32 }
  0xae   :  { %v144_v28 = vadd.f32 %v143_v27, %v142_v26  ;;  %v356_v26 = vmov 16.0  }
  0xb0   :  { %v145_v29 = vrot.slane %v144_v28, 2 }
  0xb2   :  { %v146_v30 = vadd.f32 %v145_v29, %v144_v28 }
  0xb4   :  { %v147_v33 = vrot.slane %v146_v30, 1 }
  0xb6   :  { %v148_v35 = vadd.f32 %v147_v33, %v146_v30 }
  0xb8   :  { %v149_v36 = vadd.f32 %v148_v35, %v135_v34 }
  0xba   :  { %151 = vst.msk [vmem:[#allocation5] sm:$0x1] %vm88_vm1, %v149_v36 }
  0xc1   :  { %v201_v57 = vld [vmem:[#allocation5] sm:$0x1] }
 0x103   :  { %v100_v39 = vpop.xlane.xlu0 %99 }
 0x104   :  { %v102_v40 = vmax.f32 %v101_v38, %v100_v39 }
 0x106   :  { %v104_v41 = vsub.f32 %v101_v38, %v102_v40  ;;  %122 = vst.msk [vmem:[#allocation2] sm:$0xff] %vm94_vm3, %v102_v40  ;;  %110 = vperm.xlu0 %268, %v102_v40  }
 0x108   :  { %v105_v48 = vmul.f32 1.442695, %v104_v41 }
 0x10d   :  { %v179_v2 = vld [vmem:[#allocation2] sm:$0xff] }
 0x178   :  { %v111_v42 = vpop.permute.xlu0 %110 }
 0x179   :  { %v113_v43 = vsub.f32 %v79_v10, %v111_v42 }
 0x17b   :  { %v114_v44 = vmul.f32 1.442695, %v113_v43 }
 0x17d   :  { %275 = vpow2.f32 %v114_v44 }
 0x17e   :  { %277 = vpow2.f32 %v105_v48 }
 0x183   :  { %v276_v45 = vpop.eup %275 }
 0x184   :  { %v116_v46 = vsel %vm97_vm2, %v276_v45, 0.0  ;;  %v278_v49 = vpop.eup %277 }
 0x185   :  { %117 = vadd.xlane.f32.xlu1 %v116_v46  ;;  %v107_v51 = vmul.f32 %v278_v49, %v103_v50 }
 0x18d   :  { %159 = vadd.xlane.f32.xlu1 %v158_v47 }
 0x1f8   :  { %v118_v52 = vpop.xlane.xlu1 %117 }
 0x1f9   :  { %v119_v53 = vadd.f32 %v118_v52, %v107_v51 }
 0x1fb   :  { %121 = vst.msk [vmem:[#allocation3] sm:$0xff] %vm94_vm3, %v119_v53 }
 0x200   :  { %v160_v54 = vpop.xlane.xlu1 %159 }
 0x201   :  { %v161_v55 = vrot.slane %v160_v54, 4 }
 0x202   :  { %v180_v56 = vld [vmem:[#allocation3] sm:$0xff] }
 0x203   :  { %v162_v58 = vadd.f32 %v161_v55, %v160_v54  ;;  %279 = vlog2.f32 %v180_v56 }
 0x204   :  { %281 = vlog2.f32 %v201_v57 }
 0x205   :  { %v163_v59 = vrot.slane %v162_v58, 2  ;;  %283 = vrcp.f32 %v356_v26 }
 0x207   :  { %v164_v60 = vadd.f32 %v163_v59, %v162_v58 }
 0x209   :  { %v280_v61 = vpop.eup %279  ;;  %v165_v62 = vrot.slane %v164_v60, 1 }
 0x20a   :  { %v182_v63 = vmul.f32 0.6931472, %v280_v61  ;;  %v282_v0 = vpop.eup %281 }
 0x20b   :  { %v166_v1 = vadd.f32 %v165_v62, %v164_v60  ;;  %v203_v5 = vmul.f32 0.6931472, %v282_v0  ;;  %v284_v27 = vpop.eup %283 }
 0x20c   :  { %v183_v3 = vadd.f32 %v182_v63, %v179_v2  ;;  %v220_v28 = vmul.f32 16.0, %v284_v27  ;;  %vm224_vm5 = vweird.f32 %v284_v27 }
 0x20d   :  { %251 = vpush %v166_v1  ;;  %v204_v7 = vadd.f32 %v203_v5, %v200_v6 }
 0x20e   :  { %v184_v4 = vsel %vm94_vm3, %v183_v3, 0.0  ;;  %v221_v29 = vsub.f32 1.0, %v220_v28 }
 0x20f   :  { %185 = vadd.xlane.f32.xlu2 %v184_v4  ;;  %v205_v8 = vsel %vm88_vm1, %v204_v7, 0.0 }
 0x210   :  { %v222_v33 = vmul.f32 %v284_v27, %v221_v29 }
 0x212   :  { %v223_v34 = vadd.f32 %v284_v27, %v222_v33 }
 0x214   :  { %v225_v38 = vsel %vm224_vm5, %v284_v27, %v223_v34 }
 0x217   :  { %206 = vadd.xlane.f32.xlu2 %v205_v8 }
 0x23e   :  { %s252_s2 = spop %251 }
 0x23f   :  { %s168_s23 = smul.f32 %s252_s2, %s394_s0 }
 0x241   :  { %s170_s24 = smul.f32 2.0, %s168_s23 }
 0x243   :  { %v171_v10 = vstv %s170_s24 }
 0x244   :  { %v172_v11 = vsub.f32 %v169_v9, %v171_v10 }
 0x246   :  { %174 = vst.msk [vmem:[#allocation6] sm:$0x1] %vm86_vm4, %v172_v11 }
 0x24d   :  { %v178_v30 = vld [vmem:[#allocation6] sm:$0x1] }
 0x282   :  { %v186_v12 = vpop.xlane.xlu2 %185 }
 0x283   :  { %v187_v13 = vrot.slane %v186_v12, 4 }
 0x285   :  { %v188_v14 = vadd.f32 %v187_v13, %v186_v12 }
 0x287   :  { %v189_v15 = vrot.slane %v188_v14, 2 }
 0x289   :  { %v190_v16 = vadd.f32 %v189_v15, %v188_v14 }
 0x28a   :  { %v207_v17 = vpop.xlane.xlu2 %206 }
 0x28b   :  { %v208_v18 = vrot.slane %v207_v17, 4  ;;  %v191_v19 = vrot.slane %v190_v16, 1 }
 0x28d   :  { %v209_v20 = vadd.f32 %v208_v18, %v207_v17  ;;  %v192_v21 = vadd.f32 %v191_v19, %v190_v16 }
 0x28f   :  { %v210_v22 = vrot.slane %v209_v20, 2  ;;  %253 = vpush %v192_v21 }
 0x291   :  { %v211_v23 = vadd.f32 %v210_v22, %v209_v20 }
 0x293   :  { %v212_v24 = vrot.slane %v211_v23, 1 }
 0x295   :  { %v213_v25 = vadd.f32 %v212_v24, %v211_v23 }
 0x297   :  { %255 = vpush %v213_v25 }
 0x2c0   :  { %s254_s25 = spop %253 }
 0x2c1   :  { %v194_v31 = vstv %s254_s25 }
 0x2c2   :  { %v195_v32 = vadd.f32 %v194_v31, %v178_v30 }
 0x2c4   :  { %197 = vst.msk [vmem:[#allocation6] sm:$0x1] %vm86_vm4, %v195_v32 }
 0x2c8   :  { %s256_s26 = spop %255 }
 0x2c9   :  { %v216_v35 = vstv %s256_s26 }
 0x2cb   :  { %v215_v36 = vld [vmem:[#allocation6] sm:$0x1] }
 0x2cc   :  { %v217_v37 = vadd.f32 %v216_v35, %v215_v36 }
 0x2ce   :  { %257 = vpush %v217_v37 }
 0x2cf   :  { %259 = vpush %v225_v38 }
 0x2ff   :  { %s258_s30 = spop %257 }
 0x300   :  { %s260_s4 = spop %259 }
 0x301   :  { %s227_s5 = smul.f32 %s260_s4, %s258_s30 }
 0x303   :  { %229 = sst [smem:[#allocation13]] %s227_s5 }
 0x304   :  { %238 = dma.smem_to_hbm %s357_s6, 16, %s236_s29, [#allocation10]  }
 0x305   :  { %349 = dma.done.wait [#allocation10], 16  }
 0x306   :  { %350 = vsyncadd [#allocation10], 4294967280 }
 0x307   :  { %243 = sfence }
 0x308   :  { %244 = vsyncpa [#allocation9], 1 }
 0x309   :  { %245 = vsyncpa [#allocation12], 1 }
 0x30a   :  { %246 = vsyncpa [#allocation10], 1 }

</bundles_post_ra>
